<compile_context>
chip_gen: v6e
topology: v6e:2x2x1
jax: 0.10.0
libtpu: 0.0.40
codegen_flags: <defaults>
</compile_context>

<pallas_src>
import functools
from dataclasses import dataclass
from typing import Any

import jax
import jax.numpy as jnp
from jax.experimental import pallas as pl
from jax.experimental.pallas import tpu as pltpu


# ----------------------------------------------------------------------------
# Minimal stand-in for difflogic's SparseHypergraph container.
# ----------------------------------------------------------------------------
@dataclass
class SparseHypergraph:
    val: jnp.ndarray          # [num_entries, feature_dim]
    n: int                    # number of objects
    arity: int                # hyperedge arity
    feature_dim: int          # channel dim of val
    coo: Any                  # coordinates of the sparse entries (opaque here)

    def num_entries(self) -> int:
        return int(self.val.shape[0])


# ----------------------------------------------------------------------------
# Helpers: chip-dependent packing factor, bucketing, tiling, block-diag weights.
# ----------------------------------------------------------------------------
def _default_pack_factor():
    """Rows packed along the lane axis per kernel row.

    8x on v6e/v7x: fills the 256-wide MXU K dim and makes the f32 output
    (out_dim=16) natively 128 lanes wide.  4x on v5e and older: 8x replication
    would push arithmetic intensity past v5e's ~240 flop/byte roofline
    crossover and flip the kernel MXU-bound.
    """
    try:
        kind = jax.devices()[0].device_kind.lower()
    except Exception:
        return 8
    if any(v in kind for v in ("v2", "v3", "v4", "v5")):
        return 4
    return 8


def _next_pow2(n: int) -> int:
    return 1 << max(0, (int(n) - 1)).bit_length()


def _bucket_rows(n: int, pack: int) -> int:
    """Round n up to a bounded set of sizes (<=12.5% padding, few compiles).

    Quantum is max(256, next_pow2(n)/8); always a multiple of 16*pack so the
    padded array reshapes cleanly into packed rows with a bf16-friendly
    (multiple of 16) sublane count.
    """
    quantum = max(256, _next_pow2(n) // 8, 16 * pack)
    return ((n + quantum - 1) // quantum) * quantum


def _choose_tile(packed_n: int, cap: int = 256) -> int:
    """Packed-row tile: multiple of 16 (bf16 sublane), >=4 grid steps when
    possible (so 'parallel' semantics can shard across v7x's 2 TensorCores),
    capped so per-block VMEM stays ~1-2 MiB."""
    target = (packed_n + 3) // 4
    t = max(16, ((target + 15) // 16) * 16)
    return min(t, cap)


def _block_diag(w: jnp.ndarray, p: int) -> jnp.ndarray:
    """[din, dout] -> [p*din, p*dout] with w on the diagonal blocks."""
    din, dout = w.shape
    out = jnp.zeros((p * din, p * dout), w.dtype)
    for i in range(p):
        out = out.at[i * din:(i + 1) * din, i * dout:(i + 1) * dout].set(w)
    return out


# ----------------------------------------------------------------------------
# Pallas kernel: fused 2-layer MLP over a tile of lane-packed rows.
# ----------------------------------------------------------------------------
def _packed_mlp_kernel(x_ref, w1_ref, b1_ref, w2_ref, b2_ref, o_ref):
    # x_ref : [T, P*in]        bf16, streamed
    # w1_ref: [P*in, P*hid]    bf16 block-diagonal, resident (constant index_map)
    # b1_ref: [1, P*hid]       f32
    # w2_ref: [P*hid, P*out]   bf16 block-diagonal, resident
    # b2_ref: [1, P*out]       f32
    # o_ref : [T, P*out]       f32 (128-lane dense for P=8, out=16)
    h = jnp.dot(x_ref[...], w1_ref[...], preferred_element_type=jnp.float32)
    h = jnp.maximum(h + b1_ref[...], 0.0)               # bias+ReLU in f32 (VPU)
    y = jnp.dot(h.astype(jnp.bfloat16), w2_ref[...],
                preferred_element_type=jnp.float32)
    o_ref[...] = (y + b2_ref[...]).astype(o_ref.dtype)


@functools.partial(jax.jit, static_argnames=("tile_rows",))
def _packed_mlp_pallas(xp, w1b, b1b, w2b, b2b, *, tile_rows):
    """xp: [Np, P*in] bf16 (lane-packed rows). Returns [Np, P*out] f32."""
    np_rows, pin = xp.shape
    phid = w1b.shape[1]
    pout = w2b.shape[1]

    grid = (pl.cdiv(np_rows, tile_rows),)

    flops = 2 * np_rows * (pin * phid + phid * pout)
    bytes_accessed = (
        xp.size * xp.dtype.itemsize                     # streamed bf16 input
        + np_rows * pout * 4                            # f32 output
        + w1b.size * w1b.dtype.itemsize + w2b.size * w2b.dtype.itemsize
        + b1b.size * 4 + b2b.size * 4)
    cost = pl.CostEstimate(flops=flops, transcendentals=0,
                           bytes_accessed=bytes_accessed)

    return pl.pallas_call(
        _packed_mlp_kernel,
        out_shape=jax.ShapeDtypeStruct((np_rows, pout), jnp.float32),
        grid_spec=pl.GridSpec(
            grid=grid,
            in_specs=[
                pl.BlockSpec((tile_rows, pin), lambda i: (i, 0)),
                pl.BlockSpec((w1b.shape[0], phid), lambda i: (0, 0)),
                pl.BlockSpec((1, phid), lambda i: (0, 0)),
                pl.BlockSpec((phid, pout), lambda i: (0, 0)),
                pl.BlockSpec((1, pout), lambda i: (0, 0)),
            ],
            out_specs=pl.BlockSpec((tile_rows, pout), lambda i: (i, 0)),
        ),
        compiler_params=pltpu.CompilerParams(
            dimension_semantics=("parallel",),   # grid steps independent ->
                                                 # shardable across v7x's 2 TCs
        ),
        cost_estimate=cost,
    )(xp, w1b, b1b, w2b, b2b)


# ----------------------------------------------------------------------------
# SparseInferenceBase equivalent.
# ----------------------------------------------------------------------------
class SparseInferenceBase:
    """MLP with parameters shared among all axes except the channel axis."""

    TILE_ROWS_MAX = 256   # packed rows per block (= up to 2048 original rows
                          # at P=8): ~1-2 MiB per block, grid stays >=2 steps.

    def __init__(self, input_dim, output_dim, hidden_dim, *, key):
        self.input_dim = input_dim
        self.output_dim = output_dim
        self.hidden_dim = hidden_dim
        self.pack = _default_pack_factor()

        k1, k2, k3, k4 = jax.random.split(key, 4)
        s1 = 1.0 / (input_dim ** 0.5)
        s2 = 1.0 / (hidden_dim ** 0.5)
        # Canonical (unpacked) parameters; weights in bf16 (MXU-native),
        # biases in f32 (added after the f32 accumulate).
        self.w1 = jax.random.uniform(
            k1, (input_dim, hidden_dim), jnp.float32, -s1, s1).astype(jnp.bfloat16)
        self.b1 = jax.random.uniform(k2, (1, hidden_dim), jnp.float32, -s1, s1)
        self.w2 = jax.random.uniform(
            k3, (hidden_dim, output_dim), jnp.float32, -s2, s2).astype(jnp.bfloat16)
        self.b2 = jax.random.uniform(k4, (1, output_dim), jnp.float32, -s2, s2)

        # Lane-packed (block-diagonal) parameters built once; <0.5 MiB bf16,
        # kept resident in VMEM by the constant index_map.
        p = self.pack
        self.w1b = _block_diag(self.w1, p)          # [P*in,  P*hid]
        self.w2b = _block_diag(self.w2, p)          # [P*hid, P*out]
        self.b1b = jnp.tile(self.b1, (1, p))        # [1, P*hid]
        self.b2b = jnp.tile(self.b2, (1, p))        # [1, P*out]

    def get_output_dim(self, input_dim):
        return self.output_dim

    # -- fused MLP over the concatenated rows (one pallas launch) -------------
    def _mlp(self, val):
        n = int(val.shape[0])
        p = self.pack
        padded = _bucket_rows(n, p)

        # Cast + pad fuse into the surrounding concat fusion: the kernel reads
        # a bf16 stream from HBM (half the read traffic of f32).
        x = val.astype(jnp.bfloat16)
        if padded > n:
            x = jnp.pad(x, ((0, padded - n), (0, 0)))
        xp = x.reshape(padded // p, p * self.input_dim)   # free row-major view

        tile = _choose_tile(padded // p, self.TILE_ROWS_MAX)
        yp = _packed_mlp_pallas(xp, self.w1b, self.b1b, self.w2b, self.b2b,
                                tile_rows=tile)           # [Np, P*out] f32
        y = yp.reshape(padded, self.output_dim)           # free reshape
        return y[:n]

    def __call__(self, inputs):
        # Exactly the original semantics: concat -> MLP -> split.
        counts = [t.num_entries() for t in inputs]
        val = jnp.concatenate([t.val for t in inputs], axis=0)
        out = self._mlp(val)

        outputs = []
        idx = 0
        for t, c in zip(inputs, counts):
            outputs.append(SparseHypergraph(out[idx:idx + c], t.n, t.arity,
                                            self.output_dim, t.coo))
            idx += c
        return outputs


# ----------------------------------------------------------------------------
# Reference (plain JAX) with the same bf16-input / f32-accumulate numerics.
# ----------------------------------------------------------------------------
def _ref_mlp(x, w1, b1, w2, b2):
    h = jnp.dot(x.astype(jnp.bfloat16), w1,
                preferred_element_type=jnp.float32) + b1
    h = jnp.maximum(h, 0.0)
    return jnp.dot(h.astype(jnp.bfloat16), w2,
                   preferred_element_type=jnp.float32) + b2


if __name__ == "__main__":
    key = jax.random.PRNGKey(0)
    k_mod, k_v1, k_v2, k_v3 = jax.random.split(key, 4)

    input_dim, hidden_dim, output_dim = 32, 64, 16
    model = SparseInferenceBase(input_dim, output_dim, hidden_dim, key=k_mod)

    # Three small sparse hypergraphs with different entry counts; the total is
    # padded/bucketed and run as ONE packed pallas launch, then split back.
    hg1 = SparseHypergraph(
        val=jax.random.normal(k_v1, (40, input_dim), jnp.float32),
        n=8, arity=2, feature_dim=input_dim,
        coo=jnp.arange(40, dtype=jnp.int32))
    hg2 = SparseHypergraph(
        val=jax.random.normal(k_v2, (72, input_dim), jnp.float32),
        n=6, arity=3, feature_dim=input_dim,
        coo=jnp.arange(72, dtype=jnp.int32))
    hg3 = SparseHypergraph(
        val=jax.random.normal(k_v3, (300, input_dim), jnp.float32),
        n=20, arity=2, feature_dim=input_dim,
        coo=jnp.arange(300, dtype=jnp.int32))

    inputs = [hg1, hg2, hg3]
    outputs = model(inputs)
    for o in outputs:
        jax.block_until_ready(o.val)

    # Correctness check against a pure-JAX reference with matching numerics.
    for t, o in zip(inputs, outputs):
        assert o.val.shape == (t.num_entries(), output_dim)
        ref = _ref_mlp(t.val, model.w1, model.b1, model.w2, model.b2)
        assert jnp.allclose(o.val, ref, atol=5e-3, rtol=5e-3), "mismatch vs reference"

    print("KERNEL_OK")
</pallas_src>

<mosaic_0001>
module attributes {stable_mosaic.version = 11 : i64} {
  func.func @_packed_mlp_kernel(%arg0: i32, %arg1: memref<16x256xbf16, #tpu.memory_space<vmem>>, %arg2: memref<256x512xbf16, #tpu.memory_space<vmem>>, %arg3: memref<1x512xf32, #tpu.memory_space<vmem>>, %arg4: memref<512x128xbf16, #tpu.memory_space<vmem>>, %arg5: memref<1x128xf32, #tpu.memory_space<vmem>>, %arg6: memref<16x128xf32, #tpu.memory_space<vmem>>) attributes {dimension_semantics = [#tpu.dimension_semantics<parallel>], iteration_bounds = array<i64: 4>, scalar_prefetch = 0 : i64, scratch_operands = 0 : i64, tpu.core_type = #tpu.core_type<tc>, window_params = [{transform_indices = @transform_0, window_bounds = array<i64: 16, 256>}, {pipeline_mode = #tpu.pipeline_mode<synchronous>, transform_indices = @transform_1, window_bounds = array<i64: 256, 512>}, {pipeline_mode = #tpu.pipeline_mode<synchronous>, transform_indices = @transform_2, window_bounds = array<i64: 1, 512>}, {pipeline_mode = #tpu.pipeline_mode<synchronous>, transform_indices = @transform_3, window_bounds = array<i64: 512, 128>}, {pipeline_mode = #tpu.pipeline_mode<synchronous>, transform_indices = @transform_4, window_bounds = array<i64: 1, 128>}, {transform_indices = @transform_5, window_bounds = array<i64: 16, 128>}]} {
    %c0 = arith.constant 0 : index
    %c0_0 = arith.constant 0 : index
    %0 = vector.load %arg1[%c0, %c0_0] : memref<16x256xbf16, #tpu.memory_space<vmem>>, vector<16x256xbf16>
    %c0_1 = arith.constant 0 : index
    %c0_2 = arith.constant 0 : index
    %1 = vector.load %arg2[%c0_1, %c0_2] : memref<256x512xbf16, #tpu.memory_space<vmem>>, vector<256x512xbf16>
    %cst = arith.constant dense<0.000000e+00> : vector<16x512xf32>
    %2 = tpu.matmul %0, %1, %cst {dimension_numbers = #tpu.dot_dimension_numbers<[1], [0], [0], [1], [0, 0, 1, 1], [], []>} : vector<16x256xbf16>, vector<256x512xbf16>, vector<16x512xf32> -> vector<16x512xf32>
    %c0_3 = arith.constant 0 : index
    %c0_4 = arith.constant 0 : index
    %3 = vector.load %arg3[%c0_3, %c0_4] : memref<1x512xf32, #tpu.memory_space<vmem>>, vector<1x512xf32>
    %4 = vector.broadcast %3 : vector<1x512xf32> to vector<16x512xf32>
    %5 = arith.addf %2, %4 : vector<16x512xf32>
    %cst_5 = arith.constant 0.000000e+00 : f32
    %6 = vector.broadcast %cst_5 : f32 to vector<16x512xf32>
    %7 = arith.maximumf %5, %6 : vector<16x512xf32>
    %8 = arith.truncf %7 : vector<16x512xf32> to vector<16x512xbf16>
    %c0_6 = arith.constant 0 : index
    %c0_7 = arith.constant 0 : index
    %9 = vector.load %arg4[%c0_6, %c0_7] : memref<512x128xbf16, #tpu.memory_space<vmem>>, vector<512x128xbf16>
    %cst_8 = arith.constant dense<0.000000e+00> : vector<16x128xf32>
    %10 = tpu.matmul %8, %9, %cst_8 {dimension_numbers = #tpu.dot_dimension_numbers<[1], [0], [0], [1], [0, 0, 1, 1], [], []>} : vector<16x512xbf16>, vector<512x128xbf16>, vector<16x128xf32> -> vector<16x128xf32>
    %c0_9 = arith.constant 0 : index
    %c0_10 = arith.constant 0 : index
    %11 = vector.load %arg5[%c0_9, %c0_10] : memref<1x128xf32, #tpu.memory_space<vmem>>, vector<1x128xf32>
    %12 = vector.broadcast %11 : vector<1x128xf32> to vector<16x128xf32>
    %13 = arith.addf %10, %12 : vector<16x128xf32>
    %c0_11 = arith.constant 0 : index
    %c0_12 = arith.constant 0 : index
    %14 = vector.load %arg6[%c0_11, %c0_12] : memref<16x128xf32, #tpu.memory_space<vmem>>, vector<16x128xf32>
    tpu.vector_store %arg6[%c0_11, %c0_12], %13 {strides = array<i32>} : memref<16x128xf32, #tpu.memory_space<vmem>>, vector<16x128xf32>,
    return
  }
  func.func @transform_0(%arg0: i32) -> (i32, i32) {
    %c0_i32 = arith.constant 0 : i32
    %c0_i32_0 = arith.constant 0 : i32
    return %arg0, %c0_i32 : i32, i32
  }
  func.func @transform_1(%arg0: i32) -> (i32, i32) {
    %c0_i32 = arith.constant 0 : i32
    %c0_i32_0 = arith.constant 0 : i32
    %c0_i32_1 = arith.constant 0 : i32
    return %c0_i32, %c0_i32_0 : i32, i32
  }
  func.func @transform_2(%arg0: i32) -> (i32, i32) {
    %c0_i32 = arith.constant 0 : i32
    %c0_i32_0 = arith.constant 0 : i32
    %c0_i32_1 = arith.constant 0 : i32
    return %c0_i32, %c0_i32_0 : i32, i32
  }
  func.func @transform_3(%arg0: i32) -> (i32, i32) {
    %c0_i32 = arith.constant 0 : i32
    %c0_i32_0 = arith.constant 0 : i32
    %c0_i32_1 = arith.constant 0 : i32
    return %c0_i32, %c0_i32_0 : i32, i32
  }
  func.func @transform_4(%arg0: i32) -> (i32, i32) {
    %c0_i32 = arith.constant 0 : i32
    %c0_i32_0 = arith.constant 0 : i32
    %c0_i32_1 = arith.constant 0 : i32
    return %c0_i32, %c0_i32_0 : i32, i32
  }
  func.func @transform_5(%arg0: i32) -> (i32, i32) {
    %c0_i32 = arith.constant 0 : i32
    %c0_i32_0 = arith.constant 0 : i32
    return %arg0, %c0_i32 : i32, i32
  }
}

</mosaic_0001>

<bundles_post_ra>
// kernel: _packed_mlp_pallas.1
= control target key start
LH: loop header
LB: loop body
LE: loop exit
PB: predicated region body
PF: predicated region fallthrough
CT: control target
= control target key end

     0   :  { %10 = vsyncpa [#allocation3], 0  ;;  %s2083_s0 = inlined_call_operand.hbm [shape: bf16[64,256], index: 0, kind: input, shape index: {}]   ;;  %s2084_s1 = inlined_call_operand.hbm [shape: bf16[256,512], index: 1, kind: input, shape index: {}]   ;;  %s2085_s2 = inlined_call_operand.hbm [shape: f32[1,512], index: 2, kind: input, shape index: {}]   ;;  %s2086_s3 = inlined_call_operand.hbm [shape: bf16[512,128], index: 3, kind: input, shape index: {}]   ;;  %s2087_s4 = inlined_call_operand.vmem [shape: f32[1,128], index: 4, kind: input, shape index: {}]   ;;  %s2088_s5 = inlined_call_operand.hbm [shape: f32[64,128], index: 5, kind: output, shape index: {}]  }
   0x1   :  { %12 = vsyncpa [#allocation3 + $0x1], 0 }
   0x2   :  { %13 = vsyncpa [#allocation6], 0 }
   0x3   :  { %14 = vsyncpa [#allocation9], 0 }
   0x4   :  { %15 = vsyncpa [#allocation4], 0 }
   0x5   :  { %17 = vsyncpa [#allocation4 + $0x1], 0  ;;  %s1874_s18 = smov 0   ;;  %s1876_s19 = smov 0  }
   0x6   :  { %s1878_s20 = smov 0   ;;  %s1880_s21 = smov 0  }
   0x7 LB: > { %s1895_s22 = sadd.s32 4294967295, %s1829_s21   ;;  %s1268_s23 = sadd.s32 4294967294, %s1829_s21   ;;  %s1829_s21 = sphi %s1880_s21, %s2111_s21   ;;  %s1825_s20 = sphi %s1878_s20, %s2110_s20   ;;  %s1821_s19 = sphi %s1876_s19, %s2109_s19   ;;  %s1817_s18 = sphi %s1874_s18, %s2108_s18  }
   0x8   : > { %p43_p0 = scmp.ne.s32.totalorder %s1821_s19, %s1817_s18  ;;  %p2089_p1 = scmp.eq.s32.totalorder %s1895_s22, 0 }
   0x9   : > { %p157_p3 = scmp.eq.s32.totalorder %s1268_s23, 3  ;;  %p1269_p5 = scmp.ge.s32.totalorder %s1829_s21, 1 }
   0xa   : > { %p1904_p4 = por %p2089_p1, %p43_p0  ;;  %p164_p7 = scmp.lt.s32.totalorder %s1829_s21, 5 }
   0xb   : > { %p1909_p6 = por %p157_p3, %p43_p0  ;;  %s1831_s27 = smov [#allocation5]  }
   0xc   : > { %s2093_s24 = scalar_select %p1904_p4, 1, 0 }
   0xd   : > { %s2094_s25 = scalar_select %p1909_p6, 1, 0 }
   0xe   : > { %p1914_p8 = pnand %p1269_p5, %p164_p7  ;;  %s176_s28 = sshll.u32 %s1831_s27, 4  ;;  %s177_s28 = int_to_ptr.vmem [resolvable:$true] %s176_s28 }
   0xf   : > { %s1832_s30 = smov [#allocation7]   ;;  %s1833_s7 = smov [#allocation8]  }
  0x10   : > { %s2095_s26 = scalar_select %p1914_p8, 1, 0 }
  0x11   : > { %p1451_p9 = pneg %p1914_p8  ;;  %s190_s6 = sshll.u32 %s1832_s30, 4  ;;  %s191_s6 = int_to_ptr.vmem [resolvable:$true] %s190_s6 }
  0x12   : > { %s200_s8 = sshll.u32 %s1833_s7, 4  ;;  %s1662_s9 = scalar_lea.vmem %s177_s28, 8192  ;;  %s201_s8 = int_to_ptr.vmem [resolvable:$true] %s200_s8 }
  0x13   : > { %p1922_p10 = pnand %p1451_p9, %p2089_p1  ;;  %p1663_p12 = scmp.ne.s32.totalorder %s177_s28, %s1662_s9 }
  0x14   : > { %p1670_p3 = scmp.lt.s32.totalorder %s177_s28, %s177_s28  ;;  %p1671_p5 = scmp.lt.s32.totalorder %s1662_s9, %s1662_s9 }
  0x15   : > { %p1653_p11 = pneg %p1922_p10 }
  0x16   : > { %p1672_p7 = por %p1671_p5, %p1670_p3 }
  0x17   : > { %p1665_p13 = pnand %p1663_p12, %p1653_p11 }
  0x19   : > { %p1666_p0 = pneg %p1665_p13 }
  0x1b   : > { %p1673_p9 = pnand %p1672_p7, %p1666_p0 }
  0x1d   : > { %1676 = shalt.err (!%p1673_p9)
}
  0x1e   : > { %s1834_s10 = smov 256   ;;  %s1835_s11 = smov 16  }
  0x1f   : > { %1454 = dma.hbm_to_vmem [thread:$0]  (!%p1922_p10), %s2084_s1, 8192, %s177_s28, [#allocation6], %s1834_s10, %s1834_s10, %s1835_s11  }
  0x20   : > { %s1688_s14 = scalar_lea.vmem %s191_s6, 64  ;;  %p1696_p2 = scmp.lt.s32.totalorder %s191_s6, %s191_s6 }
  0x21   : > { %p1689_p1 = scmp.ne.s32.totalorder %s191_s6, %s1688_s14  ;;  %p1697_p6 = scmp.lt.s32.totalorder %s1688_s14, %s1688_s14 }
  0x23   : > { %p1691_p12 = pnand %p1689_p1, %p1653_p11  ;;  %p1698_p3 = por %p1697_p6, %p1696_p2 }
  0x25   : > { %p1692_p13 = pneg %p1691_p12 }
  0x27   : > { %p1699_p0 = pnand %p1698_p3, %p1692_p13 }
  0x29   : > { %1702 = shalt.err (!%p1699_p0)
}
  0x2a   : > { %1457 = dma.hbm_to_vmem [thread:$0]  (!%p1922_p10), %s2085_s2, 64, %s191_s6, [#allocation6]  }
  0x2b   : > { %s1714_s17 = scalar_lea.vmem %s201_s8, 4096  ;;  %p1722_p9 = scmp.lt.s32.totalorder %s201_s8, %s201_s8 }
  0x2c   : > { %p1715_p5 = scmp.ne.s32.totalorder %s201_s8, %s1714_s17  ;;  %p1723_p12 = scmp.lt.s32.totalorder %s1714_s17, %s1714_s17 }
  0x2e   : > { %p1717_p7 = pnand %p1715_p5, %p1653_p11  ;;  %p1724_p4 = por %p1723_p12, %p1722_p9 }
  0x30   : > { %p1718_p1 = pneg %p1717_p7 }
  0x32   : > { %p1725_p2 = pnand %p1724_p4, %p1718_p1 }
  0x34   : > { %1728 = shalt.err (!%p1725_p2)
}
  0x35   : > { %s1836_s23 = smov 64   ;;  %s1837_s27 = smov 4  }
  0x36   : > { %1460 = dma.hbm_to_vmem [thread:$0]  (!%p1922_p10), %s2086_s3, 4096, %s201_s8, [#allocation9], %s1836_s23, %s1836_s23, %s1837_s27  }
  0x37   : > { %s1953_s6 = sadd.s32 1, %s1829_s21   ;;  %s30_s9 = sadd.s32 1, %s1825_s20 }
  0x38   : > { %s27_s7 = ssub.s32 %s1829_s21, %s1953_s6  ;;  %p37_p6 = scmp.ne.s32.totalorder %s1825_s20, %s1821_s19 }
  0x39   : > { %p28_p4 = scmp.eq.s32.totalorder %s27_s7, 0  ;;  %p38_p11 = scmp.eq.s32.totalorder %s1829_s21, 0 }
  0x3a   : > { %p1472_p13 = scmp.lt.s32.totalorder %s1829_s21, 4  ;;  %p2097_p0 = scmp.eq.s32.totalorder %s1895_s22, 3 }
  0x3b   : > { %s1963_s10 = scalar_select %p28_p4, %s1825_s20, %s30_s9  }
  0x3c   : > { %p39_p3 = por %p38_p11, %p37_p6  ;;  %p1967_p5 = por %p2097_p0, %p37_p6 }
  0x3d   : > { %s217_s29 = sand.u32 1, %s1825_s20   ;;  %s1389_s12 = sshll.u32 %s1829_s21, 8 }
  0x3e   : > { %s2098_s11 = scalar_select %p1967_p5, 1, 0 }
  0x3f   : > { %s1274_s8 = sshll.u32 %s217_s29, 4  ;;  %s1976_s15 = scalar_lea.hbm %s2083_s0, %s1389_s12 }
  0x40   : > { %s221_s16 = scalar_lea.vmem [#allocation2], %s1274_s8  ;;  %p1978_p10 = pnand %p1472_p13, %p39_p3 }
  0x41   : > { %s229_s17 = sshll.u32 %s221_s16, 4  ;;  %s1984_s27 = scalar_lea.sflag [#allocation3], %s217_s29  ;;  %s1982_s17 = int_to_ptr.vmem [resolvable:$true] %s229_s17 }
  0x42   : > { %s1729_s28 = scalar_lea.hbm %s1976_s15, 256  ;;  %p1731_p1 = pneg %p1978_p10 }
  0x43   : > { %p1730_p7 = scmp.ne.s32.totalorder %s1976_s15, %s1729_s28  ;;  %s1734_s9 = scalar_lea.hbm %s2083_s0, 1024 }
  0x44   : > { %p1735_p2 = scmp.lt.s32.totalorder %s1976_s15, %s2083_s0  ;;  %p1736_p4 = scmp.lt.s32.totalorder %s1734_s9, %s1729_s28 }
  0x45   : > { %p1732_p9 = pnand %p1731_p1, %p1730_p7 }
  0x46   : > { %p1737_p6 = por %p1736_p4, %p1735_p2 }
  0x47   : > { %p1733_p12 = pneg %p1732_p9 }
  0x49   : > { %p1738_p11 = pnand %p1737_p6, %p1733_p12 }
  0x4b   : > { %1741 = shalt.err (!%p1738_p11)
}
  0x4c   : > { %s1742_s29 = scalar_lea.vmem %s1982_s17, 256  ;;  %s1838_s13 = smov [#allocation2]  }
  0x4d   : > { %p1743_p13 = scmp.ne.s32.totalorder %s1982_s17, %s1742_s29  ;;  %s1747_s14 = sshll.u32 %s1838_s13, 4  ;;  %s1748_s14 = int_to_ptr.vmem [resolvable:$false] %s1747_s14 }
  0x4e   : > { %s1749_s16 = scalar_lea.vmem %s1748_s14, 512  ;;  %p1750_p7 = scmp.lt.s32.totalorder %s1982_s17, %s1748_s14 }
  0x4f   : > { %p1745_p3 = pnand %p1743_p13, %p1731_p1  ;;  %p1751_p9 = scmp.lt.s32.totalorder %s1749_s16, %s1742_s29 }
  0x51   : > { %p1746_p0 = pneg %p1745_p3  ;;  %p1752_p5 = por %p1751_p9, %p1750_p7 }
  0x53   : > { %p1753_p8 = pnand %p1752_p5, %p1746_p0 }
  0x55   : > { %1756 = shalt.err (!%p1753_p8)
}
  0x56   : > { %s1839_s28 = smov 128   ;;  %s1840_s30 = smov 8  }
  0x57   : > { %1464 = dma.hbm_to_vmem [thread:$0]  (!%p1978_p10), %s1976_s15, 256, %s1982_s17, %s1984_s27, %s1839_s28, %s1839_s28, %s1840_s30  }
  0x58   : > { %p2100_p1 = scmp.ne.s32.totalorder %s2095_s26, 0 }
  0x59   : > { %s2008_s7 = sand.u32 (!%p2100_p1), 1, %s1821_s19   ;;  %p2101_p8 = scmp.ne.s32.totalorder (!%p2100_p1), %s2093_s24, 0 }
  0x5a   : > { %241 = sbr.rel (%p2100_p1) target bundleno = 592 (0x250), region = 40  ;;  %s1279_s9 = sshll.u32 (!%p2100_p1), %s2008_s7, 4 }
  0x5b   : > { %s244_s12 = scalar_lea.sflag (!%p2100_p1), [#allocation3], %s2008_s7  ;;  %s2014_s8 = scalar_lea.vmem (!%p2100_p1), [#allocation2], %s1279_s9 }
  0x5f   : > { %1800 = dma.done.wait (%p2101_p8), %s244_s12, 256  }
  0x60   : > { %1802 = vsyncadd (%p2101_p8), %s244_s12, 4294967040  ;;  %p2102_p5 = scmp.eq.s32.totalorder %s1895_s22, 0 }
  0x62   : > { %1804 = dma.done.wait (%p2102_p5), [#allocation6], 8256   ;;  %p2103_p10 = pmov %p2102_p5 }
  0x63   : > { %p2104_p12 = pmov %p2102_p5 }
  0x64   : > { %1806 = vsyncadd (%p2103_p10), [#allocation6], 4294959040 }
  0x65   : > { %1808 = dma.done.wait (%p2104_p12), [#allocation9], 4096   ;;  %p2105_p2 = pmov %p2102_p5 }
  0x66   : > { %v1520_v0 = vld [vmem:[#allocation5 + $0xe4] ss:$16 sps:$4 sm:$0xff]   ;;  %v1522_v1 = vld [vmem:[#allocation5 + $0xec] ss:$16 sps:$4 sm:$0xff]   ;;  %v1524_v2 = vld [vmem:[#allocation5 + $0xe0] ss:$16 sps:$4 sm:$0xff]  }
  0x67   : > { %1810 = vsyncadd (%p2105_p2), [#allocation9], 4294963200  ;;  %707 = vmatprep.subr.bf16.mxu0 %v1520_v0  ;;  %v1525_v3 = vld [vmem:[#allocation5 + $0xe8] ss:$16 sps:$4 sm:$0xff]   ;;  %750 = vmatprep.subr.bf16.mxu1 %v1522_v1  ;;  %v1526_v4 = vld [vmem:[#allocation5 + $0xc4] ss:$16 sps:$4 sm:$0xff]  }
  0x68   : > { %708 = vmatpush1.bf16.msra.mxu0 %v1524_v2  ;;  %751 = vmatpush1.bf16.msra.mxu1 %v1525_v3  ;;  %v1528_v5 = vld [vmem:[#allocation5 + $0xcc] ss:$16 sps:$4 sm:$0xff]   ;;  %v1530_v6 = vld [vmem:[#allocation5 + $0xc0] ss:$16 sps:$4 sm:$0xff]   ;;  %v1531_v7 = vld [vmem:[#allocation5 + $0xc8] ss:$16 sps:$4 sm:$0xff]  }
  0x69   : > { %709 = vmatprep.subr.bf16.mxu0 %v1526_v4  ;;  %752 = vmatprep.subr.bf16.mxu1 %v1528_v5  ;;  %v1532_v8 = vld [vmem:[#allocation5 + $0xa4] ss:$16 sps:$4 sm:$0xff]   ;;  %v1534_v9 = vld [vmem:[#allocation5 + $0xac] ss:$16 sps:$4 sm:$0xff]   ;;  %v1536_v10 = vld [vmem:[#allocation5 + $0xa0] ss:$16 sps:$4 sm:$0xff]  }
  0x6a   : > { %v1537_v11 = vld [vmem:[#allocation5 + $0xa8] ss:$16 sps:$4 sm:$0xff]   ;;  %v1538_v12 = vld [vmem:[#allocation5 + $0x84] ss:$16 sps:$4 sm:$0xff]   ;;  %v1540_v13 = vld [vmem:[#allocation5 + $0x8c] ss:$16 sps:$4 sm:$0xff]  }
  0x6b   : > { %v1542_v14 = vld [vmem:[#allocation5 + $0x80] ss:$16 sps:$4 sm:$0xff]   ;;  %v1543_v15 = vld [vmem:[#allocation5 + $0x88] ss:$16 sps:$4 sm:$0xff]   ;;  %v1544_v16 = vld [vmem:[#allocation5 + $0x64] ss:$16 sps:$4 sm:$0xff]  }
  0x6c   : > { %710 = vmatpush1.bf16.msra.mxu0 %v1530_v6  ;;  %753 = vmatpush1.bf16.msra.mxu1 %v1531_v7  ;;  %v1546_v17 = vld [vmem:[#allocation5 + $0x6c] ss:$16 sps:$4 sm:$0xff]   ;;  %v1548_v18 = vld [vmem:[#allocation5 + $0x60] ss:$16 sps:$4 sm:$0xff]   ;;  %v1549_v19 = vld [vmem:[#allocation5 + $0x68] ss:$16 sps:$4 sm:$0xff]  }
  0x6d   : > { %711 = vmatprep.subr.bf16.mxu0 %v1532_v8  ;;  %754 = vmatprep.subr.bf16.mxu1 %v1534_v9  ;;  %v1550_v20 = vld [vmem:[#allocation5 + $0x44] ss:$16 sps:$4 sm:$0xff]   ;;  %v1552_v21 = vld [vmem:[#allocation5 + $0x4c] ss:$16 sps:$4 sm:$0xff]   ;;  %v1554_v22 = vld [vmem:[#allocation5 + $0x40] ss:$16 sps:$4 sm:$0xff]  }
  0x6e   : > { %v1555_v23 = vld [vmem:[#allocation5 + $0x48] ss:$16 sps:$4 sm:$0xff]   ;;  %v1556_v24 = vld [vmem:[#allocation5 + $0x24] ss:$16 sps:$4 sm:$0xff]   ;;  %v1558_v25 = vld [vmem:[#allocation5 + $0x2c] ss:$16 sps:$4 sm:$0xff]  }
  0x6f   : > { %v1560_v26 = vld [vmem:[#allocation5 + $0x20] ss:$16 sps:$4 sm:$0xff]   ;;  %v1561_v27 = vld [vmem:[#allocation5 + $0x28] ss:$16 sps:$4 sm:$0xff]   ;;  %v1562_v28 = vld [vmem:[#allocation5 + $0x4] ss:$16 sps:$4 sm:$0xff]  }
  0x70   : > { %712 = vmatpush1.bf16.msra.mxu0 %v1536_v10  ;;  %755 = vmatpush1.bf16.msra.mxu1 %v1537_v11  ;;  %v1564_v29 = vld [vmem:[#allocation5 + $0xc] ss:$16 sps:$4 sm:$0xff]   ;;  %v1566_v30 = vld [vmem:[#allocation5] ss:$16 sps:$4 sm:$0xff]   ;;  %v1567_v31 = vld [vmem:[#allocation5 + $0x8] ss:$16 sps:$4 sm:$0xff]  }
  0x71   : > { %713 = vmatprep.subr.bf16.mxu0 %v1538_v12  ;;  %756 = vmatprep.subr.bf16.mxu1 %v1540_v13  ;;  %v1568_v32 = vld [vmem:[#allocation5 + $0x1e4] ss:$16 sps:$4 sm:$0xff]   ;;  %v1570_v33 = vld [vmem:[#allocation5 + $0x1ec] ss:$16 sps:$4 sm:$0xff]   ;;  %v1572_v34 = vld [vmem:[#allocation5 + $0x1e0] ss:$16 sps:$4 sm:$0xff]  }
  0x72   : > { %v1573_v35 = vld [vmem:[#allocation5 + $0x1e8] ss:$16 sps:$4 sm:$0xff]   ;;  %v1574_v36 = vld [vmem:[#allocation5 + $0x1c4] ss:$16 sps:$4 sm:$0xff]   ;;  %v1576_v37 = vld [vmem:[#allocation5 + $0x1cc] ss:$16 sps:$4 sm:$0xff]  }
  0x73   : > { %v1578_v38 = vld [vmem:[#allocation5 + $0x1c0] ss:$16 sps:$4 sm:$0xff]   ;;  %v1579_v39 = vld [vmem:[#allocation5 + $0x1c8] ss:$16 sps:$4 sm:$0xff]   ;;  %v1580_v40 = vld [vmem:[#allocation5 + $0x1a4] ss:$16 sps:$4 sm:$0xff]  }
  0x74   : > { %714 = vmatpush1.bf16.msra.mxu0 %v1542_v14  ;;  %757 = vmatpush1.bf16.msra.mxu1 %v1543_v15  ;;  %v1582_v41 = vld [vmem:[#allocation5 + $0x1ac] ss:$16 sps:$4 sm:$0xff]   ;;  %v1584_v42 = vld [vmem:[#allocation5 + $0x1a0] ss:$16 sps:$4 sm:$0xff]   ;;  %v1585_v43 = vld [vmem:[#allocation5 + $0x1a8] ss:$16 sps:$4 sm:$0xff]  }
  0x75   : > { %715 = vmatprep.subr.bf16.mxu0 %v1544_v16  ;;  %758 = vmatprep.subr.bf16.mxu1 %v1546_v17  ;;  %v1586_v44 = vld [vmem:[#allocation5 + $0x184] ss:$16 sps:$4 sm:$0xff]   ;;  %v1588_v45 = vld [vmem:[#allocation5 + $0x18c] ss:$16 sps:$4 sm:$0xff]   ;;  %v1590_v46 = vld [vmem:[#allocation5 + $0x180] ss:$16 sps:$4 sm:$0xff]  }
  0x76   : > { %v1591_v47 = vld [vmem:[#allocation5 + $0x188] ss:$16 sps:$4 sm:$0xff]   ;;  %v1618_v48 = vld [vmem:[%s2014_s8 + $0x4] ss:$8 sps:$4 sm:$0xff]   ;;  %v1596_v51 = vld [vmem:[#allocation5 + $0x160] ss:$16 sps:$4 sm:$0xff]  }
  0x77   : > { %v1592_v49 = vld [vmem:[#allocation5 + $0x164] ss:$16 sps:$4 sm:$0xff]   ;;  %v1594_v50 = vld [vmem:[#allocation5 + $0x16c] ss:$16 sps:$4 sm:$0xff]   ;;  %739 = vmatprep.mubr.bf16.mxu0 %v1618_v48  ;;  %782 = vmatprep.mubr.bf16.mxu1 %v1618_v48  ;;  %v1597_v52 = vld [vmem:[#allocation5 + $0x168] ss:$16 sps:$4 sm:$0xff]  }
  0x78   : > { %716 = vmatpush1.bf16.msra.mxu0 %v1548_v18  ;;  %759 = vmatpush1.bf16.msra.mxu1 %v1549_v19  ;;  %v1598_v53 = vld [vmem:[#allocation5 + $0x144] ss:$16 sps:$4 sm:$0xff]   ;;  %v1600_v54 = vld [vmem:[#allocation5 + $0x14c] ss:$16 sps:$4 sm:$0xff]   ;;  %v1602_v55 = vld [vmem:[#allocation5 + $0x140] ss:$16 sps:$4 sm:$0xff]  }
  0x79   : > { %717 = vmatprep.subr.bf16.mxu0 %v1550_v20  ;;  %760 = vmatprep.subr.bf16.mxu1 %v1552_v21  ;;  %v1603_v56 = vld [vmem:[#allocation5 + $0x148] ss:$16 sps:$4 sm:$0xff]   ;;  %v1604_v57 = vld [vmem:[#allocation5 + $0x124] ss:$16 sps:$4 sm:$0xff]   ;;  %v1606_v58 = vld [vmem:[#allocation5 + $0x12c] ss:$16 sps:$4 sm:$0xff]  }
  0x7a   : > { %v1608_v59 = vld [vmem:[#allocation5 + $0x120] ss:$16 sps:$4 sm:$0xff]   ;;  %v1609_v60 = vld [vmem:[#allocation5 + $0x128] ss:$16 sps:$4 sm:$0xff]   ;;  %v1610_v61 = vld [vmem:[#allocation5 + $0x104] ss:$16 sps:$4 sm:$0xff]  }
  0x7b   : > { %v1612_v62 = vld [vmem:[#allocation5 + $0x10c] ss:$16 sps:$4 sm:$0xff]   ;;  %v1614_v63 = vld [vmem:[#allocation5 + $0x100] ss:$16 sps:$4 sm:$0xff]   ;;  %v1615_v0 = vld [vmem:[#allocation5 + $0x108] ss:$16 sps:$4 sm:$0xff]  }
  0x7c   : > { %718 = vmatpush1.bf16.msra.mxu0 %v1554_v22  ;;  %761 = vmatpush1.bf16.msra.mxu1 %v1555_v23  ;;  %v1619_v1 = vld [vmem:[#allocation8 + $0x78] sm:$0xff]   ;;  %v1623_v6 = vld [vmem:[#allocation8 + $0x70] sm:$0xff]   ;;  %v1627_v10 = vld [vmem:[#allocation8 + $0x68] sm:$0xff]   ;;  %s285_s15 = scalar_lea.vmem [#allocation10], %s1279_s9  ;;  %s1390_s23 = sshll.u32 %s1895_s22, 8 }
  0x7d   : > { %719 = vmatprep.subr.bf16.mxu0 %v1556_v24  ;;  %762 = vmatprep.subr.bf16.mxu1 %v1558_v25  ;;  %v1616_v2 = vld [vmem:[%s2014_s8] ss:$8 sps:$4 sm:$0xff]   ;;  %s1166_s17 = sshll.u32 %s285_s15, 4  ;;  %s2041_s13 = scalar_lea.hbm %s2088_s5, %s1390_s23  ;;  %s2036_s17 = int_to_ptr.vmem [resolvable:$true] %s1166_s17 }
  0x7e   : > { %v1620_v3 = vld [vmem:[#allocation8 + $0xf8] sm:$0xff]   ;;  %v1624_v7 = vld [vmem:[#allocation8 + $0xf0] sm:$0xff]   ;;  %v1628_v11 = vld [vmem:[#allocation8 + $0xe8] sm:$0xff]   ;;  %s1153_s14 = scalar_lea.sflag [#allocation4], %s2008_s7  ;;  %s1757_s16 = scalar_lea.vmem %s2036_s17, 256 }
  0x7f   : > { %v1621_v4 = vld [vmem:[#allocation8 + $0x38] sm:$0xff]   ;;  %v1625_v8 = vld [vmem:[#allocation8 + $0x30] sm:$0xff]   ;;  %v1629_v12 = vld [vmem:[#allocation8 + $0x28] sm:$0xff]   ;;  %p1758_p4 = scmp.ne.s32.totalorder %s2036_s17, %s1757_s16  ;;  %p2106_p6 = scmp.ne.s32.totalorder %s2098_s11, 0 }
  0x80   : > { %720 = vmatpush1.bf16.msra.mxu0 %v1560_v26  ;;  %763 = vmatpush1.bf16.msra.mxu1 %v1561_v27  ;;  %v1622_v5 = vld [vmem:[#allocation8 + $0xb8] sm:$0xff]   ;;  %v1626_v9 = vld [vmem:[#allocation8 + $0xb0] sm:$0xff]   ;;  %v1630_v13 = vld [vmem:[#allocation8 + $0xa8] sm:$0xff]   ;;  %s1841_s22 = smov [#allocation10]  }
  0x81   : > { %721 = vmatprep.subr.bf16.mxu0 %v1562_v28  ;;  %764 = vmatprep.subr.bf16.mxu1 %v1564_v29  ;;  %v1631_v14 = vld [vmem:[#allocation8 + $0x60] sm:$0xff]   ;;  %v1635_v18 = vld [vmem:[#allocation8 + $0x58] sm:$0xff]   ;;  %v1639_v22 = vld [vmem:[#allocation8 + $0x50] sm:$0xff]   ;;  %p1759_p11 = pnand %p1758_p4, %p2106_p6  ;;  %s1761_s28 = sshll.u32 %s1841_s22, 4  ;;  %s1762_s28 = int_to_ptr.vmem [resolvable:$false] %s1761_s28 }
  0x82   : > { %v1632_v15 = vld [vmem:[#allocation8 + $0xe0] sm:$0xff]   ;;  %v1636_v19 = vld [vmem:[#allocation8 + $0xd8] sm:$0xff]   ;;  %v1640_v23 = vld [vmem:[#allocation8 + $0xd0] sm:$0xff]   ;;  %s1763_s30 = scalar_lea.vmem %s1762_s28, 512  ;;  %p1764_p3 = scmp.lt.s32.totalorder %s2036_s17, %s1762_s28 }
  0x83   : > { %v1633_v16 = vld [vmem:[#allocation8 + $0x20] sm:$0xff]   ;;  %v1637_v20 = vld [vmem:[#allocation8 + $0x18] sm:$0xff]   ;;  %v1641_v24 = vld [vmem:[#allocation8 + $0x10] sm:$0xff]   ;;  %p1760_p13 = pneg %p1759_p11  ;;  %p1765_p0 = scmp.lt.s32.totalorder %s1763_s30, %s1757_s16 }
  0x84   : > { %722 = vmatpush1.bf16.msra.mxu0 %v1566_v30  ;;  %765 = vmatpush1.bf16.msra.mxu1 %v1567_v31  ;;  %v1634_v17 = vld [vmem:[#allocation8 + $0xa0] sm:$0xff]   ;;  %v1638_v21 = vld [vmem:[#allocation8 + $0x98] sm:$0xff]   ;;  %v1642_v25 = vld [vmem:[#allocation8 + $0x90] sm:$0xff]  }
  0x85   : > { %723 = vmatprep.subr.bf16.mxu0 %v1568_v32  ;;  %766 = vmatprep.subr.bf16.mxu1 %v1570_v33  ;;  %v1643_v26 = vld [vmem:[#allocation8 + $0x48] sm:$0xff]   ;;  %v1647_v30 = vld [vmem:[#allocation8 + $0x40] sm:$0xff]   ;;  %p1766_p7 = por %p1765_p0, %p1764_p3 }
  0x86   : > { %v1644_v27 = vld [vmem:[#allocation8 + $0xc8] sm:$0xff]   ;;  %v1648_v31 = vld [vmem:[#allocation8 + $0xc0] sm:$0xff]  }
  0x87   : > { %v1645_v28 = vld [vmem:[#allocation8 + $0x8] sm:$0xff]   ;;  %v1649_v32 = vld [vmem:[#allocation8] sm:$0xff]   ;;  %p1767_p9 = pnand %p1766_p7, %p1760_p13 }
  0x88   : > { %724 = vmatpush2.bf16.msra.mxu0 %v1572_v34  ;;  %767 = vmatpush2.bf16.msra.mxu1 %v1573_v35  ;;  %v1646_v29 = vld [vmem:[#allocation8 + $0x88] sm:$0xff]   ;;  %v1650_v33 = vld [vmem:[#allocation8 + $0x80] sm:$0xff]   ;;  %v357_v34 = vlaneseq }
  0x89   : > { %725 = vmatprep.subr.bf16.mxu0 %v1574_v36  ;;  %768 = vmatprep.subr.bf16.mxu1 %v1576_v37 }
  0x8a   : > { %v358_v35 = vshrl.u32 %v357_v34, 7 }
  0x8c   : > { %726 = vmatpush2.bf16.msra.mxu0 %v1578_v38  ;;  %769 = vmatpush2.bf16.msra.mxu1 %v1579_v39  ;;  %v363_v36 = vsub.s32 1, %v358_v35  ;;  %v371_v37 = vsub.s32 3, %v358_v35  ;;  %v359_v38 = vsub.s32 0, %v358_v35  ;;  %v367_v39 = vsub.s32 2, %v358_v35 }
  0x8d   : > { %727 = vmatprep.subr.bf16.mxu0 %v1580_v40  ;;  %770 = vmatprep.subr.bf16.mxu1 %v1582_v41  ;;  %v355_v40 = vld [vmem:[#allocation7] sm:$0xf] }
  0x90   : > { %728 = vmatpush2.bf16.msra.mxu0 %v1584_v42  ;;  %771 = vmatpush2.bf16.msra.mxu1 %v1585_v43  ;;  %v364_v43 = vrot.slane %v355_v40, %v363_v36 }
  0x91   : > { %729 = vmatprep.subr.bf16.mxu0 %v1586_v44  ;;  %772 = vmatprep.subr.bf16.mxu1 %v1588_v45  ;;  %v372_v44 = vrot.slane %v355_v40, %v371_v37  ;;  %v360_v45 = vrot.slane %v355_v40, %v359_v38 }
  0x94   : > { %730 = vmatpush2.bf16.msra.mxu0 %v1590_v46  ;;  %773 = vmatpush2.bf16.msra.mxu1 %v1591_v47  ;;  %v368_v46 = vrot.slane %v355_v40, %v367_v39 }
  0x95   : > { %731 = vmatprep.subr.bf16.mxu0 %v1592_v49  ;;  %774 = vmatprep.subr.bf16.mxu1 %v1594_v50 }
  0x98   : > { %732 = vmatpush2.bf16.msra.mxu0 %v1596_v51  ;;  %775 = vmatpush2.bf16.msra.mxu1 %v1597_v52 }
  0x99   : > { %733 = vmatprep.subr.bf16.mxu0 %v1598_v53  ;;  %776 = vmatprep.subr.bf16.mxu1 %v1600_v54 }
  0x9c   : > { %734 = vmatpush2.bf16.msra.mxu0 %v1602_v55  ;;  %777 = vmatpush2.bf16.msra.mxu1 %v1603_v56 }
  0x9d   : > { %735 = vmatprep.subr.bf16.mxu0 %v1604_v57  ;;  %778 = vmatprep.subr.bf16.mxu1 %v1606_v58 }
  0xa0   : > { %736 = vmatpush2.bf16.msra.mxu0 %v1608_v59  ;;  %779 = vmatpush2.bf16.msra.mxu1 %v1609_v60 }
  0xa1   : > { %737 = vmatprep.subr.bf16.mxu0 %v1610_v61  ;;  %780 = vmatprep.subr.bf16.mxu1 %v1612_v62 }
  0xa4   : > { %738 = vmatpush2.bf16.msra.mxu0 %v1614_v63  ;;  %781 = vmatpush2.bf16.msra.mxu1 %v1615_v0 }
  0xa5   : > { %1391 = vmatprep.subr.bf16.mxu0 %v1619_v1  ;;  %1413 = vmatprep.subr.bf16.mxu1 %v1620_v3 }
  0xa7   : > { %740 = vmatmul.mubr.bf16.vlgmr.msra.gmra.mxu0 %v1616_v2  ;;  %783 = vmatmul.mubr.bf16.vlgmr.msra.gmra.mxu1 %v1616_v2 }
  0xa8   : > { %1392 = vmatpush3.bf16.msra.mxu0 %v1621_v4  ;;  %1414 = vmatpush3.bf16.msra.mxu1 %v1622_v5 }
  0xa9   : > { %1393 = vmatprep.subr.bf16.mxu0 %v1623_v6  ;;  %1415 = vmatprep.subr.bf16.mxu1 %v1624_v7 }
  0xac   : > { %1394 = vmatpush3.bf16.msra.mxu0 %v1625_v8  ;;  %1416 = vmatpush3.bf16.msra.mxu1 %v1626_v9 }
  0xad   : > { %1395 = vmatprep.subr.bf16.mxu0 %v1627_v10  ;;  %1417 = vmatprep.subr.bf16.mxu1 %v1628_v11  ;;  %v1350_v11 = vld [vmem:[%s2087_s4] ss:$0 sm:$0xff] }
  0xb0   : > { %1396 = vmatpush3.bf16.msra.mxu0 %v1629_v12  ;;  %1418 = vmatpush3.bf16.msra.mxu1 %v1630_v13 }
  0xb1   : > { %1397 = vmatprep.subr.bf16.mxu0 %v1631_v14  ;;  %1419 = vmatprep.subr.bf16.mxu1 %v1632_v15 }
  0xb4   : > { %1398 = vmatpush3.bf16.msra.mxu0 %v1633_v16  ;;  %1420 = vmatpush3.bf16.msra.mxu1 %v1634_v17 }
  0xb5   : > { %1399 = vmatprep.subr.bf16.mxu0 %v1635_v18  ;;  %1421 = vmatprep.subr.bf16.mxu1 %v1636_v19 }
  0xb8   : > { %1400 = vmatpush3.bf16.msra.mxu0 %v1637_v20  ;;  %1422 = vmatpush3.bf16.msra.mxu1 %v1638_v21 }
  0xb9   : > { %1401 = vmatprep.subr.bf16.mxu0 %v1639_v22  ;;  %1423 = vmatprep.subr.bf16.mxu1 %v1640_v23 }
  0xbc   : > { %1402 = vmatpush3.bf16.msra.mxu0 %v1641_v24  ;;  %1424 = vmatpush3.bf16.msra.mxu1 %v1642_v25 }
  0xbd   : > { %1403 = vmatprep.subr.bf16.mxu0 %v1643_v26  ;;  %1425 = vmatprep.subr.bf16.mxu1 %v1644_v27 }
  0xc0   : > { %1404 = vmatpush3.bf16.msra.mxu0 %v1645_v28  ;;  %1426 = vmatpush3.bf16.msra.mxu1 %v1646_v29 }
  0xc1   : > { %1405 = vmatprep.subr.bf16.mxu0 %v1647_v30  ;;  %1427 = vmatprep.subr.bf16.mxu1 %v1648_v31 }
  0xc4   : > { %1406 = vmatpush3.bf16.msra.mxu0 %v1649_v32  ;;  %1428 = vmatpush3.bf16.msra.mxu1 %v1650_v33 }
 0x167   : > { %v741_v41 = vpop.f32.mrf.mxu0  ;;  %v784_v42 = vpop.f32.mrf.mxu1 }
 0x168   : > { %v742_v55 = vadd.f32 %v741_v41, %v360_v45  ;;  %v785_v56 = vadd.f32 %v784_v42, %v368_v46 }
 0x169   : > { %v743_v47 = vpop.f32.mrf.mxu0  ;;  %v786_v48 = vpop.f32.mrf.mxu1 }
 0x16a   : > { %v744_v51 = vadd.f32 %v743_v47, %v364_v43  ;;  %v787_v52 = vadd.f32 %v786_v48, %v372_v44  ;;  %v793_v3 = vmax.f32 %v742_v55, 0.0  ;;  %v795_v4 = vmax.f32 %v785_v56, 0.0 }
 0x16b   : > { %v745_v49 = vpop.f32.mrf.mxu0  ;;  %v788_v50 = vpop.f32.mrf.mxu1 }
 0x16c   : > { %v746_v53 = vadd.f32 %v745_v49, %v360_v45  ;;  %v789_v54 = vadd.f32 %v788_v50, %v368_v46  ;;  %v794_v63 = vmax.f32 %v744_v51, 0.0  ;;  %v796_v0 = vmax.f32 %v787_v52, 0.0 }
 0x16d   : > { %v747_v57 = vpop.f32.mrf.mxu0  ;;  %v790_v58 = vpop.f32.mrf.mxu1 }
 0x16e   : > { %v748_v59 = vadd.f32 %v747_v57, %v364_v43  ;;  %v791_v60 = vadd.f32 %v790_v58, %v372_v44  ;;  %v797_v61 = vmax.f32 %v746_v53, 0.0  ;;  %v799_v62 = vmax.f32 %v789_v54, 0.0 }
 0x170   : > { %v798_v1 = vmax.f32 %v748_v59, 0.0  ;;  %v800_v2 = vmax.f32 %v791_v60, 0.0  ;;  %v801_v7 = vpack.c.bf16 %v797_v61, %v793_v3  ;;  %v803_v8 = vpack.c.bf16 %v799_v62, %v795_v4 }
 0x172   : > { %v802_v5 = vpack.c.bf16 %v798_v1, %v794_v63  ;;  %v804_v6 = vpack.c.bf16 %v800_v2, %v796_v0 }
 0x174   : > { %1100 = vmatprep.mubr.bf16.mxu0 %v802_v5  ;;  %1141 = vmatprep.mubr.bf16.mxu1 %v804_v6 }
 0x175   : > { %1101 = vmatmul.mubr.bf16.vlgmr.msra.gmra.mxu0 %v801_v7  ;;  %1142 = vmatmul.mubr.bf16.vlgmr.msra.gmra.mxu1 %v803_v8 }
 0x235   : > { %v1407_v9 = vpop.f32.mrf.mxu0  ;;  %v1429_v10 = vpop.f32.mrf.mxu1 }
 0x237   : > { %v1408_v12 = vpop.f32.mrf.mxu0  ;;  %v1430_v13 = vpop.f32.mrf.mxu1 }
 0x238   : > { %v1409_v14 = vadd.f32 %v1408_v12, %v1407_v9  ;;  %v1431_v18 = vadd.f32 %v1430_v13, %v1429_v10 }
 0x239   : > { %v1410_v15 = vpop.f32.mrf.mxu0  ;;  %v1432_v16 = vpop.f32.mrf.mxu1 }
 0x23a   : > { %v1103_v17 = vadd.f32 %v1409_v14, %v1350_v11 }
 0x23b   : > { %v1411_v19 = vpop.f32.mrf.mxu0  ;;  %v1433_v20 = vpop.f32.mrf.mxu1 }
 0x23c   : > { %v1144_v21 = vadd.f32 %v1431_v18, %v1103_v17  ;;  %v1412_v22 = vadd.f32 %v1411_v19, %v1410_v15  ;;  %v1434_v24 = vadd.f32 %v1433_v20, %v1432_v16 }
 0x23e   : > { %1150 = vst [vmem:[%s285_s15] sm:$0xff] %v1144_v21  ;;  %v1106_v23 = vadd.f32 %v1412_v22, %v1350_v11 }
 0x240   : > { %v1147_v25 = vadd.f32 %v1434_v24, %v1106_v23 }
 0x242   : > { %1151 = vst [vmem:[%s285_s15 + $0x8] sm:$0xff] %v1147_v25 }
 0x243   : > { %1770 = shalt.err (!%p1767_p9)
}
 0x244   : > { %s1771_s9 = scalar_lea.hbm %s2041_s13, 256  ;;  %s1775_s24 = scalar_lea.hbm %s2088_s5, 1024 }
 0x245   : > { %p1772_p1 = scmp.ne.s32.totalorder %s2041_s13, %s1771_s9  ;;  %p1776_p10 = scmp.lt.s32.totalorder %s2041_s13, %s2088_s5 }
 0x246   : > { %p1777_p12 = scmp.lt.s32.totalorder %s1775_s24, %s1771_s9 }
 0x247   : > { %p1773_p8 = pnand %p1772_p1, %p2106_p6 }
 0x248   : > { %p1778_p2 = por %p1777_p12, %p1776_p10 }
 0x249   : > { %p1774_p5 = pneg %p1773_p8 }
 0x24b   : > { %p1779_p4 = pnand %p1778_p2, %p1774_p5 }
 0x24d   : > { %1782 = shalt.err (!%p1779_p4)
}
 0x24e   : > { %s1842_s23 = smov 128   ;;  %s1843_s27 = smov 8  }
 0x24f   : > { %1449 = dma.vmem_to_hbm [thread:$0]  (%p2106_p6), %s2036_s17, 256, %s2041_s13, %s1153_s14, %s1842_s23, %s1842_s23, %s1843_s27  }
 0x250 PF: > { %p1476_p11 = scmp.ge.s32.totalorder %s1829_s21, 2  ;;  %s1181_s29 = sand.u32 1, %s1817_s18  }
 0x251   : > { %p2107_p13 = scmp.ne.s32.totalorder %s2094_s25, 0  ;;  %s1182_s16 = scalar_lea.sflag [#allocation4], %s1181_s29 }
 0x253   : > { %p1466_p3 = pnand %p1476_p11, %p2107_p13 }
 0x255   : > { %p1467_p0 = pneg %p1466_p3 }
 0x257   : > { %1812 = dma.done.wait (%p1467_p0), %s1182_s16, 256  }
 0x258   : > { %1814 = vsyncadd (%p1467_p0), %s1182_s16, 4294967040  ;;  %p20_p7 = scmp.ge.s32.totalorder %s1953_s6, 6   ;;  %s2108_s18 = smov %s1821_s19 }
 0x259   : > { %s2109_s19 = smov %s1825_s20  ;;  %s2110_s20 = smov %s1963_s10 }
 0x25a   : > { %s2111_s21 = smov %s1953_s6  ;;  %22 = sbr.rel (!%p20_p7) target bundleno = 7 (0x7), region = 97 }
 0x25f   :  { %1187 = vsyncpa [#allocation3], 1 }
 0x260   :  { %1189 = vsyncpa [#allocation3 + $0x1], 1 }
 0x261   :  { %1190 = vsyncpa [#allocation6], 1 }
 0x262   :  { %1191 = vsyncpa [#allocation9], 1 }
 0x263   :  { %1192 = vsyncpa [#allocation4], 1 }
 0x264   :  { %1194 = vsyncpa [#allocation4 + $0x1], 1 }

</bundles_post_ra>
